<compile_context>
chip_gen: v7x
topology: tpu7x:2x2x1
jax: 0.10.0
libtpu: 0.0.40
codegen_flags: <defaults>
</compile_context>

<pallas_src>
import functools

import jax
import jax.numpy as jnp
from jax.experimental import pallas as pl
from jax.experimental.pallas import tpu as pltpu

_LANE = 128
# Guard for the unaligned path: if a single row (last dim) is bigger than
# this, let XLA handle the op instead of building huge VMEM blocks.
_MAX_UNALIGNED_LAST_DIM_BYTES = 2 * 1024 * 1024


def _cdiv(a, b):
    return -(-a // b)


@functools.lru_cache(maxsize=1)
def _chip_block_bytes():
    """Per-chip HBM-streaming block size (bytes per buffer).

    v7x (~3.2 TB/s HBM, 32 MiB default scoped VMEM): 6 MiB blocks keep the
    per-grid-step fixed cost << DMA time; 4 buffers (in+out, double-buffered)
    = 24 MiB, under the default scoped limit and well under 64 MiB physical.
    v6e (32 MiB scoped): 4 MiB.  v5e / unknown (16 MiB scoped): 2 MiB.
    """
    try:
        kind = jax.devices()[0].device_kind.lower()
    except Exception:
        return 2 * 1024 * 1024
    if "7" in kind:
        return 6 * 1024 * 1024
    if "v6" in kind or "6e" in kind:
        return 4 * 1024 * 1024
    return 2 * 1024 * 1024


def _sublane_pack(dtype) -> int:
    """Minimum second-minor granularity for the dtype's packed vreg tile."""
    itemsize = jnp.dtype(dtype).itemsize
    return {4: 8, 2: 16, 1: 32}.get(itemsize, 8)


def _leaky_relu_kernel(x_ref, o_ref, *, negative_slope):
    x = x_ref[...]
    o_ref[...] = jnp.where(x >= 0, x, x * negative_slope)


def _leaky_relu_2d(x2d, negative_slope):
    """Run the kernel over a (rows, lane) slab (lane ideally 128-dense)."""
    rows, lane = x2d.shape
    dtype = x2d.dtype
    itemsize = jnp.dtype(dtype).itemsize
    pack = _sublane_pack(dtype)
    block_bytes = _chip_block_bytes()

    # VMEM footprint per row is padded up to a full 128-lane tile.
    lane_padded = _cdiv(lane, _LANE) * _LANE

    # Row-block size: ~block_bytes per buffer, rounded to the packed-sublane
    # multiple so stores stay unmasked along sublanes.
    tm = block_bytes // (lane_padded * itemsize)
    tm = max(pack, (tm // pack) * pack)
    if tm >= rows:
        if rows >= 2 * pack:
            # Never emit grid=(1,): a single-step grid serializes DMA-in /
            # compute / DMA-out and idles the second v7x TensorCore.  Split
            # into 2..8 blocks instead (still "parallel").
            nblk = min(8, rows // pack)
            tm = _cdiv(_cdiv(rows, nblk), pack) * pack
        else:
            tm = rows  # full-extent first dim: always a legal block shape
    grid = (_cdiv(rows, tm),)

    kernel = functools.partial(_leaky_relu_kernel,
                               negative_slope=float(negative_slope))

    # Double-buffered in + out plus headroom; bounded by ~5 * block_bytes so
    # it stays under every chip's physical VMEM.
    vmem_limit = max(16 * 1024 * 1024, 5 * tm * lane_padded * itemsize)

    # TODO(synk): with caller-side buffer donation, input_output_aliases={0: 0}
    # would avoid allocating a second full-size HBM buffer (traffic is 1R+1W
    # either way); the torch module default is inplace=False so we keep a
    # fresh output.
    return pl.pallas_call(
        kernel,
        out_shape=jax.ShapeDtypeStruct((rows, lane), dtype),
        grid_spec=pltpu.PrefetchScalarGridSpec(
            num_scalar_prefetch=0,
            grid=grid,
            in_specs=[pl.BlockSpec((tm, lane), lambda i: (i, 0))],
            out_specs=pl.BlockSpec((tm, lane), lambda i: (i, 0)),
        ),
        compiler_params=pltpu.CompilerParams(
            dimension_semantics=("parallel",),
            vmem_limit_bytes=int(vmem_limit),
        ),
        cost_estimate=pl.CostEstimate(
            flops=2 * rows * lane,          # compare + mul/select per element
            transcendentals=0,
            bytes_accessed=2 * rows * lane * itemsize,
        ),
    )(x2d)


@functools.partial(jax.jit, static_argnames=("negative_slope",))
def leaky_relu_pallas(x, negative_slope=0.01):
    if not jnp.issubdtype(x.dtype, jnp.floating):
        raise TypeError(
            f"leaky_relu_pallas expects a floating-point input, got {x.dtype} "
            "(torch.nn.functional.leaky_relu also rejects integer inputs)."
        )

    orig_shape = x.shape
    n = x.size
    if n == 0 or x.ndim == 0:
        return jnp.where(x >= 0, x, x * negative_slope)

    if n % _LANE == 0:
        # Common case: 128-aligned element count -> lane-dense (rows, 128)
        # slab with only free reshapes around the kernel (1 read + 1 write).
        out2d = _leaky_relu_2d(x.reshape(n // _LANE, _LANE), negative_slope)
        return out2d.reshape(orig_shape)

    # Non-128-multiple size: keep it a SINGLE pallas_call (1 read + 1 write)
    # by collapsing the leading dims and tiling rows.  The non-lane-dense last
    # dim costs masked stores, but avoids the slice + concatenate copies that
    # would roughly triple HBM traffic.
    last = orig_shape[-1]
    itemsize = jnp.dtype(x.dtype).itemsize
    if x.ndim < 2 or last * itemsize > _MAX_UNALIGNED_LAST_DIM_BYTES:
        # Awkward shape (unaligned 1-D, or huge unaligned last dim): let XLA
        # handle it — elementwise ops run at roofline natively.
        return jnp.where(x >= 0, x, x * negative_slope)
    lead = n // last
    out2d = _leaky_relu_2d(x.reshape(lead, last), negative_slope)
    return out2d.reshape(orig_shape)


if __name__ == "__main__":
    key = jax.random.PRNGKey(0)
    negative_slope = 0.01

    # Shape implied by the test-suite module (small 4-D activation).
    x = jax.random.normal(key, (2, 4, 16, 16), dtype=jnp.float32)
    out = jax.block_until_ready(leaky_relu_pallas(x, negative_slope=negative_slope))
    ref = jnp.where(x >= 0, x, x * negative_slope)
    assert out.shape == x.shape and out.dtype == x.dtype
    assert jnp.allclose(out, ref, atol=1e-6, rtol=1e-6)

    # Also exercise the single-call unaligned path (n not a multiple of 128).
    x2 = jax.random.normal(jax.random.PRNGKey(1), (4, 8, 21), dtype=jnp.float32)
    out2 = jax.block_until_ready(leaky_relu_pallas(x2, negative_slope=negative_slope))
    ref2 = jnp.where(x2 >= 0, x2, x2 * negative_slope)
    assert out2.shape == x2.shape and out2.dtype == x2.dtype
    assert jnp.allclose(out2, ref2, atol=1e-6, rtol=1e-6)

    print("KERNEL_OK")
</pallas_src>

<mosaic_0001>
module attributes {stable_mosaic.version = 11 : i64} {
  func.func @_leaky_relu_kernel(%arg0: i32, %arg1: memref<8x128xf32, #tpu.memory_space<vmem>>, %arg2: memref<8x128xf32, #tpu.memory_space<vmem>>) attributes {dimension_semantics = [#tpu.dimension_semantics<parallel>], iteration_bounds = array<i64: 2>, scalar_prefetch = 0 : i64, scratch_operands = 0 : i64, tpu.core_type = #tpu.core_type<tc>, window_params = [{transform_indices = @transform_0, window_bounds = array<i64: 8, 128>}, {transform_indices = @transform_1, window_bounds = array<i64: 8, 128>}]} {
    %c0 = arith.constant 0 : index
    %c0_0 = arith.constant 0 : index
    %0 = vector.load %arg1[%c0, %c0_0] : memref<8x128xf32, #tpu.memory_space<vmem>>, vector<8x128xf32>
    %cst = arith.constant 0.000000e+00 : f32
    %1 = vector.broadcast %cst : f32 to vector<8x128xf32>
    %2 = arith.cmpf oge, %0, %1 : vector<8x128xf32>
    %cst_1 = arith.constant 0.00999999977 : f32
    %3 = vector.broadcast %cst_1 : f32 to vector<8x128xf32>
    %4 = arith.mulf %0, %3 : vector<8x128xf32>
    %5 = arith.select %2, %0, %4 : vector<8x128xi1>, vector<8x128xf32>
    %c0_2 = arith.constant 0 : index
    %c0_3 = arith.constant 0 : index
    %6 = vector.load %arg2[%c0_2, %c0_3] : memref<8x128xf32, #tpu.memory_space<vmem>>, vector<8x128xf32>
    tpu.vector_store %arg2[%c0_2, %c0_3], %5 {strides = array<i32>} : memref<8x128xf32, #tpu.memory_space<vmem>>, vector<8x128xf32>,
    return
  }
  func.func @transform_0(%arg0: i32) -> (i32, i32) {
    %c0_i32 = arith.constant 0 : i32
    %c0_i32_0 = arith.constant 0 : i32
    return %arg0, %c0_i32 : i32, i32
  }
  func.func @transform_1(%arg0: i32) -> (i32, i32) {
    %c0_i32 = arith.constant 0 : i32
    %c0_i32_0 = arith.constant 0 : i32
    return %arg0, %c0_i32 : i32, i32
  }
}

</mosaic_0001>

<bundles_post_ra>
// kernel: leaky_relu_pallas.1
= control target key start
LH: loop header
LB: loop body
LE: loop exit
PB: predicated region body
PF: predicated region fallthrough
CT: control target
= control target key end

     0   :  { %s191_s6 = smov 0   ;;  %s211_s0 = inlined_call_operand.vmem [shape: f32[16,128], index: 0, kind: input, shape index: {}]   ;;  %s212_s1 = inlined_call_operand.vmem [shape: f32[16,128], index: 1, kind: output, shape index: {}]  }
   0x1 LB: > { %s170_s7 = sadd.s32 4294967295, %s193_s6   ;;  %p174_p0 = scmp.ge.s32.totalorder %s193_s6, 1  ;;  %s193_s6 = sphi %s191_s6, %s11_s6  }
   0x2   : > { %p86_p1 = scmp.lt.s32.totalorder %s193_s6, 3 }
   0x4   : > { %p87_p2 = pnand %p174_p0, %p86_p1 }
   0x5   : > { %p104_p3 = scmp.lt.s32.totalorder (!%p87_p2), %s170_s7, 1 }
   0x6   : > { %90 = sbr.rel (%p87_p2) target bundleno = 21 (0x15), region = 24 }
   0xd   : > { %s214_s7 = smov (!%p104_p3, %s170_s7), 1 }
   0xe   : > { %s175_s8 = sshll.u32 %s214_s7, 3 }
   0xf   : > { %s107_s11 = scalar_lea.vmem %s211_s0, %s175_s8  ;;  %s111_s14 = scalar_lea.vmem %s212_s1, %s175_s8 }
  0x10   : > { %v112_v0 = vld [vmem:[%s107_s11] sm:$0xff] }
  0x11   : > { %vm113_vm0 = vcmp.ge.f32.partialorder %v112_v0, 0.0  ;;  %v114_v1 = vmul.f32 0.01, %v112_v0 }
  0x13   : > { %v115_v2 = vsel %vm113_vm0, %v112_v0, %v114_v1 }
  0x14   : > { %116 = vst [vmem:[%s111_s14] sm:$0xff] %v115_v2 }
  0x15 PF: > { %s11_s6 = sadd.s32 1, %s193_s6  }
  0x16   : > { %p8_p4 = scmp.ge.s32.totalorder %s11_s6, 4  }
  0x18   :  { %10 = sbr.rel (!%p8_p4) target bundleno = 1 (0x1), region = 54 }

</bundles_post_ra>
